<compile_context>
chip_gen: v5e
topology: v5e:2x2
jax: 0.10.0
libtpu: 0.0.40
codegen_flags: <defaults>
</compile_context>

<pallas_src>
import functools

import jax
import jax.numpy as jnp
import numpy as np
from jax.experimental import pallas as pl
from jax.experimental.pallas import tpu as pltpu


# ------------------------------ tuning helpers ------------------------------ #

@functools.lru_cache(maxsize=None)
def _vmem_limit_bytes():
    # Per-generation scoped-VMEM budget: ~half of physical, capped at 96 MiB.
    # v5e/v6e (128 MiB physical) -> 64 MiB; v7x (64 MiB physical) -> 32 MiB.
    try:
        cap = pltpu.get_tpu_info().vmem_capacity_bytes
    except Exception:           # query unavailable -> conservative, safe everywhere
        cap = 64 * 1024 * 1024
    return int(max(32 * 1024 * 1024, min(cap // 2, 96 * 1024 * 1024)))


def _cparams(*sem):
    return pltpu.CompilerParams(dimension_semantics=tuple(sem),
                                vmem_limit_bytes=_vmem_limit_bytes())


def _pick_row_tile(rows):
    # Row tile for the 1x1 matmuls: divides rows (no masked tail block),
    # multiple of 8 sublanes, as large as possible while leaving >= 2 grid
    # steps so both v7x TensorCores get work.
    cands = (2048, 1024, 512, 256, 128, 64, 32, 16, 8)
    for t in cands:
        if t <= rows and rows % t == 0 and rows // t >= 2:
            return t
    for t in cands:
        if t <= rows and rows % t == 0:
            return t
    return rows


def _pick_h_tile(h, w, tc_out):
    # Row tile for the 3x3 conv: divides H, keeps the f32 accumulator
    # (th*w, tc_out) under ~256 KiB so it does not spill across the 9 taps,
    # and keeps th*w sublane-aligned (multiple of 8) for the output store.
    budget = 256 * 1024
    divs = [t for t in range(1, h + 1) if h % t == 0]

    def fits(t):
        return t * w * tc_out * 4 <= budget

    ok = [t for t in divs if fits(t) and (t * w) % 8 == 0]
    if not ok:
        ok = [t for t in divs if fits(t)]
    if not ok:
        ok = [1]
    two = [t for t in ok if h // t >= 2]
    return max(two) if two else max(ok)


def _pick_channel_tile(c, gs):
    # Smallest lane-dense (multiple-of-128) channel tile that divides C and
    # covers whole groups; small channel counts use the full C.  Smaller tiles
    # minimize the wasted FLOPs of the block-diagonal grouped weight.
    if c <= 128:
        return c
    cand = 128
    while cand <= c:
        if c % cand == 0 and cand % gs == 0:
            return cand
        cand += 128
    # TODO(synk): awkward channel counts fall back to a dense (C,C) block.
    return c


# ----------------------------- Pallas kernels ------------------------------ #

def _conv1_shortcut_kernel(x_ref, w1_ref, wsc_ref, b1_ref, o1_ref, osc_ref):
    # Fused: conv1(1x1)+bn1+relu AND the shortcut 1x1 conv, sharing one x tile.
    x = x_ref[...]                                              # (tm, cin) bf16
    y1 = jnp.dot(x, w1_ref[...], preferred_element_type=jnp.float32)
    o1_ref[...] = jnp.maximum(y1 + b1_ref[...], 0.0).astype(o1_ref.dtype)
    ysc = jnp.dot(x, wsc_ref[...], preferred_element_type=jnp.float32)
    osc_ref[...] = ysc.astype(osc_ref.dtype)        # spec: shortcut has no BN/ReLU


def _conv1_kernel(x_ref, w1_ref, b1_ref, o1_ref):
    y1 = jnp.dot(x_ref[...], w1_ref[...], preferred_element_type=jnp.float32)
    o1_ref[...] = jnp.maximum(y1 + b1_ref[...], 0.0).astype(o1_ref.dtype)


def _conv3_add_relu_kernel(x_ref, w_ref, b_ref, res_ref, o_ref):
    # conv3 (1x1) + bn3 (bias-only, scale folded) + residual add + relu, fused.
    y = jnp.dot(x_ref[...], w_ref[...], preferred_element_type=jnp.float32)
    y = y + b_ref[...] + res_ref[...].astype(jnp.float32)
    o_ref[...] = jnp.maximum(y, 0.0).astype(o_ref.dtype)


def _conv3x3_group_kernel(x_ref, w_ref, b_ref, o_ref, *, dilation, ho, wo, th):
    # Grouped 3x3 conv, stride 1.  Input tile is H-padded by `dilation` only.
    # Per output row-tile:
    #   * ky taps: leading-axis (H) slices of the VMEM ref (cheap, no relayout)
    #   * kx taps: computed un-shifted, then the f32 accumulator is shifted
    #     with a sublane roll (XLU) and edge-masked -> no strided image copies.
    d = dilation
    tc_out = w_ref.shape[-1]
    n_rt = ho // th
    nrows = th * wo

    # Width-position masks (independent of the row tile): hoisted out of the loop.
    w_idx = jax.lax.broadcasted_iota(jnp.int32, (nrows, 1), 0) % wo
    mask_l = w_idx >= d            # kx = 0 tap reads column w - d
    mask_r = w_idx < (wo - d)      # kx = 2 tap reads column w + d
    bias = b_ref[...]

    def body(rt, carry):
        row0 = rt * th
        out_acc = jnp.zeros((nrows, tc_out), jnp.float32)
        for kx in range(3):
            acc = jnp.zeros((nrows, tc_out), jnp.float32)
            for ky in range(3):
                xk = x_ref[0, pl.ds(row0 + ky * d, th)]          # (th, wo, tc_in)
                acc = acc + jnp.dot(xk.reshape(nrows, -1), w_ref[0, ky, kx],
                                    preferred_element_type=jnp.float32)
            off = (kx - 1) * d
            if off == 0:
                out_acc = out_acc + acc
            else:
                rolled = pltpu.roll(acc, shift=(-off) % nrows, axis=0)
                out_acc = out_acc + jnp.where(mask_l if off < 0 else mask_r,
                                              rolled, 0.0)
        y = jnp.maximum(out_acc + bias, 0.0)
        start = rt * nrows
        if nrows % 8 == 0:
            start = pl.multiple_of(start, 8)
        o_ref[0, pl.ds(start, nrows)] = y.astype(o_ref.dtype)
        return carry

    jax.lax.fori_loop(0, n_rt, body, 0, unroll=(n_rt <= 4))


# ------------------------------ pallas_call glue ---------------------------- #

def conv1_shortcut(x2d, w1, wsc, b1, *, tm):
    rows, cin = x2d.shape
    cmid = w1.shape[1]
    planes = wsc.shape[1]
    return pl.pallas_call(
        _conv1_shortcut_kernel,
        out_shape=(jax.ShapeDtypeStruct((rows, cmid), jnp.bfloat16),
                   jax.ShapeDtypeStruct((rows, planes), jnp.bfloat16)),
        grid=(pl.cdiv(rows, tm),),
        in_specs=[
            pl.BlockSpec((tm, cin), lambda i: (i, 0)),
            pl.BlockSpec((cin, cmid), lambda i: (0, 0)),
            pl.BlockSpec((cin, planes), lambda i: (0, 0)),
            pl.BlockSpec((1, cmid), lambda i: (0, 0)),
        ],
        out_specs=(pl.BlockSpec((tm, cmid), lambda i: (i, 0)),
                   pl.BlockSpec((tm, planes), lambda i: (i, 0))),
        compiler_params=_cparams("parallel"),
    )(x2d, w1, wsc, b1)


def conv1_only(x2d, w1, b1, *, tm):
    rows, cin = x2d.shape
    cmid = w1.shape[1]
    return pl.pallas_call(
        _conv1_kernel,
        out_shape=jax.ShapeDtypeStruct((rows, cmid), jnp.bfloat16),
        grid=(pl.cdiv(rows, tm),),
        in_specs=[
            pl.BlockSpec((tm, cin), lambda i: (i, 0)),
            pl.BlockSpec((cin, cmid), lambda i: (0, 0)),
            pl.BlockSpec((1, cmid), lambda i: (0, 0)),
        ],
        out_specs=pl.BlockSpec((tm, cmid), lambda i: (i, 0)),
        compiler_params=_cparams("parallel"),
    )(x2d, w1, b1)


def conv3x3_grouped(x_hpad, w_diag, bias, *, dilation, ho, wo, th):
    # x_hpad: (N, H + 2d, W, C)     bf16, zero-padded by `dilation` in H only
    # w_diag: (n_ct, 3, 3, tc, tc)  bf16 diagonal weight tiles (BN scale folded)
    # bias  : (1, C)                f32
    n, hp, _, c = x_hpad.shape
    n_ct = w_diag.shape[0]
    tc = w_diag.shape[-1]
    kern = functools.partial(_conv3x3_group_kernel, dilation=dilation,
                             ho=ho, wo=wo, th=th)
    return pl.pallas_call(
        kern,
        out_shape=jax.ShapeDtypeStruct((n, ho * wo, c), jnp.bfloat16),
        # Channel-tile axis OUTERMOST: the (3,3,tc,tc) weight slab and bias are
        # DMA'd once per channel tile instead of once per batch element.
        grid=(n_ct, n),
        in_specs=[
            pl.BlockSpec((1, hp, wo, tc), lambda ci, b: (b, 0, 0, ci)),
            pl.BlockSpec((1, 3, 3, tc, tc), lambda ci, b: (ci, 0, 0, 0, 0)),
            pl.BlockSpec((1, tc), lambda ci, b: (0, ci)),
        ],
        out_specs=pl.BlockSpec((1, ho * wo, tc), lambda ci, b: (b, 0, ci)),
        compiler_params=_cparams("parallel", "parallel"),
    )(x_hpad, w_diag, bias)


def conv3_add_relu(x2d, w3, b3, res2d, *, tm, out_dtype=jnp.bfloat16):
    rows, cmid = x2d.shape
    planes = w3.shape[1]
    return pl.pallas_call(
        _conv3_add_relu_kernel,
        out_shape=jax.ShapeDtypeStruct((rows, planes), out_dtype),
        grid=(pl.cdiv(rows, tm),),
        in_specs=[
            pl.BlockSpec((tm, cmid), lambda i: (i, 0)),
            pl.BlockSpec((cmid, planes), lambda i: (0, 0)),
            pl.BlockSpec((1, planes), lambda i: (0, 0)),
            pl.BlockSpec((tm, planes), lambda i: (i, 0)),
        ],
        out_specs=pl.BlockSpec((tm, planes), lambda i: (i, 0)),
        compiler_params=_cparams("parallel"),
    )(x2d, w3, b3, res2d)


# --------------------------- parameter construction ------------------------- #

def _fold_bn(gamma, beta, mean, var, eps=1e-5):
    scale = gamma / jnp.sqrt(var + eps)
    return scale, beta - mean * scale


def init_params(key, inplanes, planes):
    bottel = planes // 2
    card = bottel // 4
    gs = bottel // card                     # channels per group (in == out)
    ks = jax.random.split(key, 8)

    def conv_w(k, cout, cin, kh, kw):
        bound = 1.0 / np.sqrt(cin * kh * kw)
        return jax.random.uniform(k, (cout, cin, kh, kw), jnp.float32, -bound, bound)

    def bn(k, c):
        k1, k2, k3, k4 = jax.random.split(k, 4)
        gamma = jax.random.uniform(k1, (c,), jnp.float32, 0.5, 1.5)
        beta = jax.random.uniform(k2, (c,), jnp.float32, -0.1, 0.1)
        mean = jax.random.uniform(k3, (c,), jnp.float32, -0.1, 0.1)
        var = jax.random.uniform(k4, (c,), jnp.float32, 0.5, 1.5)
        return gamma, beta, mean, var

    raw = {
        "w1": conv_w(ks[0], bottel, inplanes, 1, 1),
        "w2": conv_w(ks[1], bottel, gs, 3, 3),      # grouped: (Cout, Cin/g, 3, 3)
        "w3": conv_w(ks[2], planes, bottel, 1, 1),
        "bn1": bn(ks[3], bottel),
        "bn2": bn(ks[4], bottel),
        "bn3": bn(ks[5], planes),
    }
    if inplanes != planes:
        raw["w_sc"] = conv_w(ks[6], planes, inplanes, 1, 1)

    s1, b1 = _fold_bn(*raw["bn1"])
    s2, b2 = _fold_bn(*raw["bn2"])
    s3, b3 = _fold_bn(*raw["bn3"])

    p = {"card": card}
    # BN scale folded into the weights (one-time preprocessing); bf16 operands.
    p["w1"] = (raw["w1"][:, :, 0, 0].T * s1[None, :]).astype(jnp.bfloat16)
    p["w3"] = (raw["w3"][:, :, 0, 0].T * s3[None, :]).astype(jnp.bfloat16)
    if "w_sc" in raw:
        p["w_sc"] = raw["w_sc"][:, :, 0, 0].T.astype(jnp.bfloat16)  # spec: no BN
    p["b1"] = b1.reshape(1, bottel).astype(jnp.float32)
    p["b2"] = b2.reshape(1, bottel).astype(jnp.float32)
    p["b3"] = b3.reshape(1, planes).astype(jnp.float32)

    # Grouped 3x3 weight -> per-channel-tile block-diagonal slabs (HWIO inside
    # each tile).  Off-diagonal (all-zero) channel tiles are never stored.
    tile_c = _pick_channel_tile(bottel, gs)
    n_ct = bottel // tile_c
    gpt = tile_c // gs                                # groups per channel tile
    w2_np = np.asarray(raw["w2"], np.float32)         # (Cout, gs, 3, 3)
    s2_np = np.asarray(s2, np.float32)
    w2_diag = np.zeros((n_ct, 3, 3, tile_c, tile_c), np.float32)
    for ci in range(n_ct):
        for gl in range(gpt):
            g = ci * gpt + gl
            blk = np.transpose(w2_np[g * gs:(g + 1) * gs], (2, 3, 1, 0))  # (3,3,in,out)
            blk = blk * s2_np[g * gs:(g + 1) * gs][None, None, None, :]
            lo = gl * gs
            w2_diag[ci, :, :, lo:lo + gs, lo:lo + gs] = blk
    p["w2"] = jnp.asarray(w2_diag).astype(jnp.bfloat16)
    p["tile_c"] = tile_c
    return raw, p


# ------------------------------- forward pass ------------------------------- #

def bottleneck_forward(x_nchw, p, *, stride=1, dilation=1, out_dtype=jnp.bfloat16):
    # TODO(synk): stride > 1 for conv2 not implemented (needs strided output taps).
    assert stride == 1
    n, cin, h, w = x_nchw.shape
    d = dilation
    assert d < w, "dilation must be smaller than the feature-map width"
    # TODO(synk): in a full network keep NHWC end-to-end; these boundary
    # transposes exist only for parity with the PyTorch NCHW interface.
    x = jnp.transpose(x_nchw, (0, 2, 3, 1))
    rows = n * h * w
    x2d = x.reshape(rows, cin).astype(jnp.bfloat16)
    tm = _pick_row_tile(rows)

    if "w_sc" in p:
        out1_2d, res2d = conv1_shortcut(x2d, p["w1"], p["w_sc"], p["b1"], tm=tm)
    else:
        out1_2d = conv1_only(x2d, p["w1"], p["b1"], tm=tm)
        res2d = x2d                                    # identity residual

    cmid = p["w1"].shape[1]
    out1 = out1_2d.reshape(n, h, w, cmid)
    # TODO(synk): fold this H-halo pad into the 3x3 kernel (boundary masking on
    # the ky taps) to remove the extra HBM round trip of out1.
    out1_hp = jnp.pad(out1, ((0, 0), (d, d), (0, 0), (0, 0)))

    th = _pick_h_tile(h, w, p["tile_c"])
    out2 = conv3x3_grouped(out1_hp, p["w2"], p["b2"],
                           dilation=d, ho=h, wo=w, th=th)
    out2_2d = out2.reshape(rows, cmid)

    out = conv3_add_relu(out2_2d, p["w3"], p["b3"], res2d, tm=tm,
                         out_dtype=out_dtype)
    planes = p["w3"].shape[1]
    out = out.reshape(n, h, w, planes)
    return jnp.transpose(out, (0, 3, 1, 2))            # back to NCHW


# ------------------------------ pure-JAX reference -------------------------- #

def reference_forward(x_nchw, raw, card, *, dilation=1):
    # Pure-JAX reference with the SAME precision policy as the kernels
    # (bf16 operands/intermediates, f32 accumulation, BN scale folded into the
    # weights) so the assert isolates the Pallas implementation itself.
    f32 = jnp.float32

    def bf(t):
        return t.astype(jnp.bfloat16).astype(f32)

    def fold(bn):
        g, b, m, v = bn
        s = g / jnp.sqrt(v + 1e-5)
        return s, b - m * s

    x = bf(jnp.transpose(x_nchw, (0, 2, 3, 1)).astype(f32))
    s1, b1 = fold(raw["bn1"])
    s2, b2 = fold(raw["bn2"])
    s3, b3 = fold(raw["bn3"])

    w1 = bf(raw["w1"][:, :, 0, 0].T * s1[None, :])
    w3 = bf(raw["w3"][:, :, 0, 0].T * s3[None, :])
    if "w_sc" in raw:
        wsc = bf(raw["w_sc"][:, :, 0, 0].T)
        res = bf(jnp.einsum("nhwc,co->nhwo", x, wsc))
    else:
        res = x

    o1 = bf(jax.nn.relu(jnp.einsum("nhwc,co->nhwo", x, w1) + b1))
    w2 = bf(jnp.transpose(raw["w2"], (2, 3, 1, 0)) * s2[None, None, None, :])
    o2 = jax.lax.conv_general_dilated(
        o1, w2, window_strides=(1, 1),
        padding=[(dilation, dilation), (dilation, dilation)],
        rhs_dilation=(dilation, dilation),
        dimension_numbers=("NHWC", "HWIO", "NHWC"),
        feature_group_count=card)
    o2 = bf(jax.nn.relu(o2 + b2))
    o = bf(jax.nn.relu(jnp.einsum("nhwc,co->nhwo", o2, w3) + b3 + res))
    return jnp.transpose(o, (0, 3, 1, 2))


# ---------------------------------- main ------------------------------------ #

if __name__ == "__main__":
    key = jax.random.PRNGKey(0)
    kx, kp = jax.random.split(key)

    N, INPLANES, PLANES, H, W = 2, 8, 16, 16, 16
    x = jax.random.normal(kx, (N, INPLANES, H, W), jnp.float32)

    raw, params = init_params(kp, INPLANES, PLANES)

    out = jax.block_until_ready(
        bottleneck_forward(x, params, stride=1, dilation=1))
    ref = jax.block_until_ready(
        reference_forward(x, raw, params["card"], dilation=1))

    assert out.shape == (N, PLANES, H, W), out.shape
    np.testing.assert_allclose(np.asarray(out).astype(np.float32),
                               np.asarray(ref).astype(np.float32),
                               rtol=2e-2, atol=2e-2)
    print("KERNEL_OK")
</pallas_src>

<mosaic_0001>
module attributes {stable_mosaic.version = 11 : i64} {
  func.func @_conv1_shortcut_kernel(%arg0: i32, %arg1: memref<256x8xbf16, #tpu.memory_space<vmem>>, %arg2: memref<8x8xbf16, #tpu.memory_space<vmem>>, %arg3: memref<8x16xbf16, #tpu.memory_space<vmem>>, %arg4: memref<1x8xf32, #tpu.memory_space<vmem>>, %arg5: memref<256x8xbf16, #tpu.memory_space<vmem>>, %arg6: memref<256x16xbf16, #tpu.memory_space<vmem>>) attributes {dimension_semantics = [#tpu.dimension_semantics<parallel>], iteration_bounds = array<i64: 2>, scalar_prefetch = 0 : i64, scratch_operands = 0 : i64, tpu.core_type = #tpu.core_type<tc>, window_params = [{transform_indices = @transform_0, window_bounds = array<i64: 256, 8>}, {pipeline_mode = #tpu.pipeline_mode<synchronous>, transform_indices = @transform_1, window_bounds = array<i64: 8, 8>}, {pipeline_mode = #tpu.pipeline_mode<synchronous>, transform_indices = @transform_2, window_bounds = array<i64: 8, 16>}, {pipeline_mode = #tpu.pipeline_mode<synchronous>, transform_indices = @transform_3, window_bounds = array<i64: 1, 8>}, {transform_indices = @transform_4, window_bounds = array<i64: 256, 8>}, {transform_indices = @transform_5, window_bounds = array<i64: 256, 16>}]} {
    %c0 = arith.constant 0 : index
    %c0_0 = arith.constant 0 : index
    %0 = vector.load %arg1[%c0, %c0_0] : memref<256x8xbf16, #tpu.memory_space<vmem>>, vector<256x8xbf16>
    %c0_1 = arith.constant 0 : index
    %c0_2 = arith.constant 0 : index
    %1 = vector.load %arg2[%c0_1, %c0_2] : memref<8x8xbf16, #tpu.memory_space<vmem>>, vector<8x8xbf16>
    %cst = arith.constant dense<0.000000e+00> : vector<256x8xf32>
    %2 = tpu.matmul %0, %1, %cst {dimension_numbers = #tpu.dot_dimension_numbers<[1], [0], [0], [1], [0, 0, 1, 1], [], []>} : vector<256x8xbf16>, vector<8x8xbf16>, vector<256x8xf32> -> vector<256x8xf32>
    %c0_3 = arith.constant 0 : index
    %c0_4 = arith.constant 0 : index
    %3 = vector.load %arg4[%c0_3, %c0_4] : memref<1x8xf32, #tpu.memory_space<vmem>>, vector<1x8xf32>
    %4 = vector.broadcast %3 : vector<1x8xf32> to vector<256x8xf32>
    %5 = arith.addf %2, %4 : vector<256x8xf32>
    %cst_5 = arith.constant 0.000000e+00 : f32
    %6 = vector.broadcast %cst_5 : f32 to vector<256x8xf32>
    %7 = arith.maximumf %5, %6 : vector<256x8xf32>
    %8 = arith.truncf %7 : vector<256x8xf32> to vector<256x8xbf16>
    %c0_6 = arith.constant 0 : index
    %c0_7 = arith.constant 0 : index
    %9 = vector.load %arg5[%c0_6, %c0_7] : memref<256x8xbf16, #tpu.memory_space<vmem>>, vector<256x8xbf16>
    tpu.vector_store %arg5[%c0_6, %c0_7], %8 {strides = array<i32>} : memref<256x8xbf16, #tpu.memory_space<vmem>>, vector<256x8xbf16>,
    %c0_8 = arith.constant 0 : index
    %c0_9 = arith.constant 0 : index
    %10 = vector.load %arg3[%c0_8, %c0_9] : memref<8x16xbf16, #tpu.memory_space<vmem>>, vector<8x16xbf16>
    %cst_10 = arith.constant dense<0.000000e+00> : vector<256x16xf32>
    %11 = tpu.matmul %0, %10, %cst_10 {dimension_numbers = #tpu.dot_dimension_numbers<[1], [0], [0], [1], [0, 0, 1, 1], [], []>} : vector<256x8xbf16>, vector<8x16xbf16>, vector<256x16xf32> -> vector<256x16xf32>
    %12 = arith.truncf %11 : vector<256x16xf32> to vector<256x16xbf16>
    %c0_11 = arith.constant 0 : index
    %c0_12 = arith.constant 0 : index
    %13 = vector.load %arg6[%c0_11, %c0_12] : memref<256x16xbf16, #tpu.memory_space<vmem>>, vector<256x16xbf16>
    tpu.vector_store %arg6[%c0_11, %c0_12], %12 {strides = array<i32>} : memref<256x16xbf16, #tpu.memory_space<vmem>>, vector<256x16xbf16>,
    return
  }
  func.func @transform_0(%arg0: i32) -> (i32, i32) {
    %c0_i32 = arith.constant 0 : i32
    %c0_i32_0 = arith.constant 0 : i32
    return %arg0, %c0_i32 : i32, i32
  }
  func.func @transform_1(%arg0: i32) -> (i32, i32) {
    %c0_i32 = arith.constant 0 : i32
    %c0_i32_0 = arith.constant 0 : i32
    %c0_i32_1 = arith.constant 0 : i32
    return %c0_i32, %c0_i32_0 : i32, i32
  }
  func.func @transform_2(%arg0: i32) -> (i32, i32) {
    %c0_i32 = arith.constant 0 : i32
    %c0_i32_0 = arith.constant 0 : i32
    %c0_i32_1 = arith.constant 0 : i32
    return %c0_i32, %c0_i32_0 : i32, i32
  }
  func.func @transform_3(%arg0: i32) -> (i32, i32) {
    %c0_i32 = arith.constant 0 : i32
    %c0_i32_0 = arith.constant 0 : i32
    %c0_i32_1 = arith.constant 0 : i32
    return %c0_i32, %c0_i32_0 : i32, i32
  }
  func.func @transform_4(%arg0: i32) -> (i32, i32) {
    %c0_i32 = arith.constant 0 : i32
    %c0_i32_0 = arith.constant 0 : i32
    return %arg0, %c0_i32 : i32, i32
  }
  func.func @transform_5(%arg0: i32) -> (i32, i32) {
    %c0_i32 = arith.constant 0 : i32
    %c0_i32_0 = arith.constant 0 : i32
    return %arg0, %c0_i32 : i32, i32
  }
}

</mosaic_0001>

<bundles_post_ra>
// kernel: tpu_custom_call.1
= control target key start
LH: loop header
LB: loop body
LE: loop exit
PB: predicated region body
PF: predicated region fallthrough
CT: control target
= control target key end

     0   :  { %s1021_s18 = smov 0   ;;  %s1271_s0 = inlined_call_operand.vmem [shape: bf16[512,8], index: 0, kind: input, shape index: {}]   ;;  %s1272_s1 = inlined_call_operand.vmem [shape: bf16[8,8], index: 1, kind: input, shape index: {}]   ;;  %s1273_s2 = inlined_call_operand.vmem [shape: bf16[8,16], index: 2, kind: input, shape index: {}]   ;;  %s1274_s3 = inlined_call_operand.vmem [shape: f32[1,8], index: 3, kind: input, shape index: {}]   ;;  %s1275_s4 = inlined_call_operand.vmem [shape: bf16[512,8], index: 4, kind: output, shape index: {0}]   ;;  %s1276_s5 = inlined_call_operand.vmem [shape: bf16[512,16], index: 5, kind: output, shape index: {1}]  }
   0x1 LB: > { %s847_s19 = sadd.s32 4294967295, %s989_s18   ;;  %p851_p0 = scmp.ge.s32.totalorder %s989_s18, 1  ;;  %s989_s18 = sphi %s1021_s18, %s16_s18  }
   0x2   : > { %p191_p1 = scmp.lt.s32.totalorder %s989_s18, 3 }
   0x4   : > { %p192_p2 = pnand %p851_p0, %p191_p1 }
   0x5   : > { %s852_s24 = sshll.u32 (!%p192_p2), %s847_s19, 5 }
   0x6   : > { %195 = sbr.rel (%p192_p2) target bundleno = 275 (0x113), region = 36  ;;  %p225_p3 = scmp.lt.s32.totalorder (!%p192_p2), %s852_s24, 63 }
   0xb   : > { %v275_v0 = vld [vmem:[%s1272_s1] sm:$0xf]  ;;  %vm409_vm0 = vcmask 1043456   ;;  %s1278_s24 = smov (!%p225_p3, %s852_s24), 63  ;;  %vm360_vm1 = vcmask 64512   ;;  %vm724_vm2 = vcmask 125952  }
   0xc   : > { %v599_v1 = vld [vmem:[%s1273_s2] sm:$0xf]  ;;  %v411_v2 = vsel %vm409_vm0, %v275_v0, 0  ;;  %s1035_s25 = sshll.u32 %s1278_s24, 2  ;;  %vm566_vm3 = vcmask 60416  }
   0xd   : > { %v601_v3 = vsel %vm409_vm0, %v599_v1, 0  ;;  %420 = vmatpush.bf16.msra.mxu0 %v411_v2  ;;  %972 = vmatpush.bf16.msra.mxu2 %v411_v2  ;;  %s1041_s28 = scalar_lea.vmem %s1271_s0, %s1035_s25  ;;  %v1094_v20 = vld [vmem:[%s1274_s3] ss:$0 sm:$0xff]  ;;  %s1101_s8 = scalar_lea.vmem %s1276_s5, %s1035_s25 }
   0xe   : > { %973 = vmatpush.bf16.msra.mxu3 %v601_v3  ;;  %610 = vmatpush.bf16.msra.mxu1 %v601_v3  ;;  %v956_v4 = vld [vmem:[%s1041_s28] sm:$0xff]  ;;  %v957_v6 = vld [vmem:[%s1041_s28 + $0x8] sm:$0xff]  ;;  %v958_v8 = vld [vmem:[%s1041_s28 + $0x10] sm:$0xff]  ;;  %s1107_s11 = scalar_lea.vmem %s1275_s4, %s1035_s25 }
   0xf   : > { %v964_v5 = vld [vmem:[%s1041_s28 + $0x40] sm:$0xff]  ;;  %v965_v7 = vld [vmem:[%s1041_s28 + $0x48] sm:$0xff]  ;;  %v966_v9 = vld [vmem:[%s1041_s28 + $0x50] sm:$0xff] }
  0x10   : > { %922 = vmatmul.msk.bf16.vlgmr.msra.gmra.mxu0 %vm360_vm1, %v956_v4  ;;  %930 = vmatmul.msk.bf16.vlgmr.msra.gmra.mxu2 %vm360_vm1, %v964_v5  ;;  %v959_v10 = vld [vmem:[%s1041_s28 + $0x18] sm:$0xff]  ;;  %v960_v12 = vld [vmem:[%s1041_s28 + $0x20] sm:$0xff]  ;;  %v961_v14 = vld [vmem:[%s1041_s28 + $0x28] sm:$0xff] }
  0x11   : > { %946 = vmatmul.msk.bf16.vlgmr.msra.gmra.mxu3 %vm360_vm1, %v964_v5  ;;  %938 = vmatmul.msk.bf16.vlgmr.msra.gmra.mxu1 %vm360_vm1, %v956_v4  ;;  %v967_v11 = vld [vmem:[%s1041_s28 + $0x58] sm:$0xff]  ;;  %v968_v13 = vld [vmem:[%s1041_s28 + $0x60] sm:$0xff]  ;;  %v969_v15 = vld [vmem:[%s1041_s28 + $0x68] sm:$0xff] }
  0x12   : > { %v962_v16 = vld [vmem:[%s1041_s28 + $0x30] sm:$0xff]  ;;  %v963_v18 = vld [vmem:[%s1041_s28 + $0x38] sm:$0xff] }
  0x13   : > { %v970_v17 = vld [vmem:[%s1041_s28 + $0x70] sm:$0xff]  ;;  %v971_v19 = vld [vmem:[%s1041_s28 + $0x78] sm:$0xff] }
  0x20   : > { %923 = vmatmul.msk.bf16.gmra.mxu0 %vm360_vm1, %v957_v6  ;;  %931 = vmatmul.msk.bf16.gmra.mxu2 %vm360_vm1, %v965_v7 }
  0x21   : > { %947 = vmatmul.msk.bf16.gmra.mxu3 %vm360_vm1, %v965_v7  ;;  %939 = vmatmul.msk.bf16.gmra.mxu1 %vm360_vm1, %v957_v6 }
  0x30   : > { %924 = vmatmul.msk.bf16.gmra.mxu0 %vm360_vm1, %v958_v8  ;;  %932 = vmatmul.msk.bf16.gmra.mxu2 %vm360_vm1, %v966_v9 }
  0x31   : > { %948 = vmatmul.msk.bf16.gmra.mxu3 %vm360_vm1, %v966_v9  ;;  %940 = vmatmul.msk.bf16.gmra.mxu1 %vm360_vm1, %v958_v8 }
  0x40   : > { %925 = vmatmul.msk.bf16.gmra.mxu0 %vm360_vm1, %v959_v10  ;;  %933 = vmatmul.msk.bf16.gmra.mxu2 %vm360_vm1, %v967_v11 }
  0x41   : > { %949 = vmatmul.msk.bf16.gmra.mxu3 %vm360_vm1, %v967_v11  ;;  %941 = vmatmul.msk.bf16.gmra.mxu1 %vm360_vm1, %v959_v10 }
  0x50   : > { %926 = vmatmul.msk.bf16.gmra.mxu0 %vm360_vm1, %v960_v12  ;;  %934 = vmatmul.msk.bf16.gmra.mxu2 %vm360_vm1, %v968_v13 }
  0x51   : > { %950 = vmatmul.msk.bf16.gmra.mxu3 %vm360_vm1, %v968_v13  ;;  %942 = vmatmul.msk.bf16.gmra.mxu1 %vm360_vm1, %v960_v12 }
  0x60   : > { %927 = vmatmul.msk.bf16.gmra.mxu0 %vm360_vm1, %v961_v14  ;;  %935 = vmatmul.msk.bf16.gmra.mxu2 %vm360_vm1, %v969_v15 }
  0x61   : > { %951 = vmatmul.msk.bf16.gmra.mxu3 %vm360_vm1, %v969_v15  ;;  %943 = vmatmul.msk.bf16.gmra.mxu1 %vm360_vm1, %v961_v14 }
  0x70   : > { %928 = vmatmul.msk.bf16.gmra.mxu0 %vm360_vm1, %v962_v16  ;;  %936 = vmatmul.msk.bf16.gmra.mxu2 %vm360_vm1, %v970_v17 }
  0x71   : > { %952 = vmatmul.msk.bf16.gmra.mxu3 %vm360_vm1, %v970_v17  ;;  %944 = vmatmul.msk.bf16.gmra.mxu1 %vm360_vm1, %v962_v16 }
  0x80   : > { %929 = vmatmul.msk.bf16.gmra.mxu0 %vm360_vm1, %v963_v18  ;;  %937 = vmatmul.msk.bf16.gmra.mxu2 %vm360_vm1, %v971_v19 }
  0x81   : > { %953 = vmatmul.msk.bf16.gmra.mxu3 %vm360_vm1, %v971_v19  ;;  %945 = vmatmul.msk.bf16.gmra.mxu1 %vm360_vm1, %v963_v18 }
  0x8d   : > { %v422_v21 = vpop.f32.mrf.mxu0 }
  0x8e   : > { %v423_v22 = vadd.f32 %v1094_v20, %v422_v21  ;;  %v612_v23 = vpop.f32.mrf.mxu1 }
  0x8f   : > { %v692_v24 = vpack.c.bf16 %v612_v23, %v612_v23 }
  0x90   : > { %v502_v25 = vmax.f32 %v423_v22, 0.0 }
  0x91   : > { %725 = vst.msk [vmem:[%s1101_s8] sm:$0xf] %vm724_vm2, %v692_v24 }
  0x92   : > { %v534_v26 = vpack.c.bf16 %v502_v25, %v502_v25 }
  0x93   : > { %v462_v27 = vpop.f32.mrf.mxu2 }
  0x94   : > { %567 = vst.msk [vmem:[%s1107_s11] sm:$0xf] %vm566_vm3, %v534_v26  ;;  %v463_v28 = vadd.f32 %v1094_v20, %v462_v27  ;;  %v652_v29 = vpop.f32.mrf.mxu3 }
  0x95   : > { %v708_v30 = vpack.c.bf16 %v652_v29, %v652_v29  ;;  %v424_v31 = vpop.f32.mrf.mxu0 }
  0x96   : > { %v518_v32 = vmax.f32 %v463_v28, 0.0  ;;  %v425_v33 = vadd.f32 %v1094_v20, %v424_v31  ;;  %v614_v34 = vpop.f32.mrf.mxu1 }
  0x97   : > { %741 = vst.msk [vmem:[%s1101_s8 + $0x40] sm:$0xf] %vm724_vm2, %v708_v30  ;;  %v693_v35 = vpack.c.bf16 %v614_v34, %v614_v34 }
  0x98   : > { %v550_v36 = vpack.c.bf16 %v518_v32, %v518_v32  ;;  %v503_v37 = vmax.f32 %v425_v33, 0.0 }
  0x99   : > { %726 = vst.msk [vmem:[%s1101_s8 + $0x4] sm:$0xf] %vm724_vm2, %v693_v35 }
  0x9a   : > { %583 = vst.msk [vmem:[%s1107_s11 + $0x40] sm:$0xf] %vm566_vm3, %v550_v36  ;;  %v535_v38 = vpack.c.bf16 %v503_v37, %v503_v37 }
  0x9b   : > { %v464_v39 = vpop.f32.mrf.mxu2 }
  0x9c   : > { %568 = vst.msk [vmem:[%s1107_s11 + $0x4] sm:$0xf] %vm566_vm3, %v535_v38  ;;  %v465_v40 = vadd.f32 %v1094_v20, %v464_v39  ;;  %v654_v41 = vpop.f32.mrf.mxu3 }
  0x9d   : > { %v709_v42 = vpack.c.bf16 %v654_v41, %v654_v41  ;;  %v427_v43 = vpop.f32.mrf.mxu0 }
  0x9e   : > { %v519_v44 = vmax.f32 %v465_v40, 0.0  ;;  %v428_v45 = vadd.f32 %v1094_v20, %v427_v43  ;;  %v617_v46 = vpop.f32.mrf.mxu1 }
  0x9f   : > { %742 = vst.msk [vmem:[%s1101_s8 + $0x44] sm:$0xf] %vm724_vm2, %v709_v42  ;;  %v694_v47 = vpack.c.bf16 %v617_v46, %v617_v46 }
  0xa0   : > { %v551_v48 = vpack.c.bf16 %v519_v44, %v519_v44  ;;  %v504_v49 = vmax.f32 %v428_v45, 0.0 }
  0xa1   : > { %727 = vst.msk [vmem:[%s1101_s8 + $0x8] sm:$0xf] %vm724_vm2, %v694_v47 }
  0xa2   : > { %584 = vst.msk [vmem:[%s1107_s11 + $0x44] sm:$0xf] %vm566_vm3, %v551_v48  ;;  %v536_v50 = vpack.c.bf16 %v504_v49, %v504_v49 }
  0xa3   : > { %v467_v51 = vpop.f32.mrf.mxu2 }
  0xa4   : > { %569 = vst.msk [vmem:[%s1107_s11 + $0x8] sm:$0xf] %vm566_vm3, %v536_v50  ;;  %v468_v52 = vadd.f32 %v1094_v20, %v467_v51  ;;  %v657_v53 = vpop.f32.mrf.mxu3 }
  0xa5   : > { %v710_v54 = vpack.c.bf16 %v657_v53, %v657_v53  ;;  %v429_v55 = vpop.f32.mrf.mxu0 }
  0xa6   : > { %v520_v56 = vmax.f32 %v468_v52, 0.0  ;;  %v430_v57 = vadd.f32 %v1094_v20, %v429_v55  ;;  %v619_v58 = vpop.f32.mrf.mxu1 }
  0xa7   : > { %743 = vst.msk [vmem:[%s1101_s8 + $0x48] sm:$0xf] %vm724_vm2, %v710_v54  ;;  %v695_v59 = vpack.c.bf16 %v619_v58, %v619_v58 }
  0xa8   : > { %v552_v60 = vpack.c.bf16 %v520_v56, %v520_v56  ;;  %v505_v61 = vmax.f32 %v430_v57, 0.0 }
  0xa9   : > { %728 = vst.msk [vmem:[%s1101_s8 + $0xc] sm:$0xf] %vm724_vm2, %v695_v59 }
  0xaa   : > { %585 = vst.msk [vmem:[%s1107_s11 + $0x48] sm:$0xf] %vm566_vm3, %v552_v60  ;;  %v537_v62 = vpack.c.bf16 %v505_v61, %v505_v61 }
  0xab   : > { %v469_v63 = vpop.f32.mrf.mxu2 }
  0xac   : > { %570 = vst.msk [vmem:[%s1107_s11 + $0xc] sm:$0xf] %vm566_vm3, %v537_v62  ;;  %v470_v0 = vadd.f32 %v1094_v20, %v469_v63  ;;  %v659_v1 = vpop.f32.mrf.mxu3 }
  0xad   : > { %v711_v2 = vpack.c.bf16 %v659_v1, %v659_v1  ;;  %v432_v3 = vpop.f32.mrf.mxu0 }
  0xae   : > { %v521_v4 = vmax.f32 %v470_v0, 0.0  ;;  %v433_v5 = vadd.f32 %v1094_v20, %v432_v3  ;;  %v622_v6 = vpop.f32.mrf.mxu1 }
  0xaf   : > { %744 = vst.msk [vmem:[%s1101_s8 + $0x4c] sm:$0xf] %vm724_vm2, %v711_v2  ;;  %v696_v7 = vpack.c.bf16 %v622_v6, %v622_v6 }
  0xb0   : > { %v553_v8 = vpack.c.bf16 %v521_v4, %v521_v4  ;;  %v506_v9 = vmax.f32 %v433_v5, 0.0 }
  0xb1   : > { %729 = vst.msk [vmem:[%s1101_s8 + $0x10] sm:$0xf] %vm724_vm2, %v696_v7 }
  0xb2   : > { %586 = vst.msk [vmem:[%s1107_s11 + $0x4c] sm:$0xf] %vm566_vm3, %v553_v8  ;;  %v538_v10 = vpack.c.bf16 %v506_v9, %v506_v9 }
  0xb3   : > { %v472_v11 = vpop.f32.mrf.mxu2 }
  0xb4   : > { %571 = vst.msk [vmem:[%s1107_s11 + $0x10] sm:$0xf] %vm566_vm3, %v538_v10  ;;  %v473_v12 = vadd.f32 %v1094_v20, %v472_v11  ;;  %v662_v13 = vpop.f32.mrf.mxu3 }
  0xb5   : > { %v712_v14 = vpack.c.bf16 %v662_v13, %v662_v13  ;;  %v434_v15 = vpop.f32.mrf.mxu0 }
  0xb6   : > { %v522_v16 = vmax.f32 %v473_v12, 0.0  ;;  %v435_v17 = vadd.f32 %v1094_v20, %v434_v15  ;;  %v624_v18 = vpop.f32.mrf.mxu1 }
  0xb7   : > { %745 = vst.msk [vmem:[%s1101_s8 + $0x50] sm:$0xf] %vm724_vm2, %v712_v14  ;;  %v697_v19 = vpack.c.bf16 %v624_v18, %v624_v18 }
  0xb8   : > { %v554_v21 = vpack.c.bf16 %v522_v16, %v522_v16  ;;  %v507_v22 = vmax.f32 %v435_v17, 0.0 }
  0xb9   : > { %730 = vst.msk [vmem:[%s1101_s8 + $0x14] sm:$0xf] %vm724_vm2, %v697_v19 }
  0xba   : > { %587 = vst.msk [vmem:[%s1107_s11 + $0x50] sm:$0xf] %vm566_vm3, %v554_v21  ;;  %v539_v23 = vpack.c.bf16 %v507_v22, %v507_v22 }
  0xbb   : > { %v474_v24 = vpop.f32.mrf.mxu2 }
  0xbc   : > { %572 = vst.msk [vmem:[%s1107_s11 + $0x14] sm:$0xf] %vm566_vm3, %v539_v23  ;;  %v475_v25 = vadd.f32 %v1094_v20, %v474_v24  ;;  %v664_v26 = vpop.f32.mrf.mxu3 }
  0xbd   : > { %v713_v27 = vpack.c.bf16 %v664_v26, %v664_v26  ;;  %v437_v28 = vpop.f32.mrf.mxu0 }
  0xbe   : > { %v523_v29 = vmax.f32 %v475_v25, 0.0  ;;  %v438_v30 = vadd.f32 %v1094_v20, %v437_v28  ;;  %v627_v31 = vpop.f32.mrf.mxu1 }
  0xbf   : > { %746 = vst.msk [vmem:[%s1101_s8 + $0x54] sm:$0xf] %vm724_vm2, %v713_v27  ;;  %v698_v32 = vpack.c.bf16 %v627_v31, %v627_v31 }
  0xc0   : > { %v555_v33 = vpack.c.bf16 %v523_v29, %v523_v29  ;;  %v508_v34 = vmax.f32 %v438_v30, 0.0 }
  0xc1   : > { %731 = vst.msk [vmem:[%s1101_s8 + $0x18] sm:$0xf] %vm724_vm2, %v698_v32 }
  0xc2   : > { %588 = vst.msk [vmem:[%s1107_s11 + $0x54] sm:$0xf] %vm566_vm3, %v555_v33  ;;  %v540_v35 = vpack.c.bf16 %v508_v34, %v508_v34 }
  0xc3   : > { %v477_v36 = vpop.f32.mrf.mxu2 }
  0xc4   : > { %573 = vst.msk [vmem:[%s1107_s11 + $0x18] sm:$0xf] %vm566_vm3, %v540_v35  ;;  %v478_v37 = vadd.f32 %v1094_v20, %v477_v36  ;;  %v667_v38 = vpop.f32.mrf.mxu3 }
  0xc5   : > { %v714_v39 = vpack.c.bf16 %v667_v38, %v667_v38  ;;  %v439_v40 = vpop.f32.mrf.mxu0 }
  0xc6   : > { %v524_v41 = vmax.f32 %v478_v37, 0.0  ;;  %v440_v42 = vadd.f32 %v1094_v20, %v439_v40  ;;  %v629_v43 = vpop.f32.mrf.mxu1 }
  0xc7   : > { %747 = vst.msk [vmem:[%s1101_s8 + $0x58] sm:$0xf] %vm724_vm2, %v714_v39  ;;  %v699_v44 = vpack.c.bf16 %v629_v43, %v629_v43 }
  0xc8   : > { %v556_v45 = vpack.c.bf16 %v524_v41, %v524_v41  ;;  %v509_v46 = vmax.f32 %v440_v42, 0.0 }
  0xc9   : > { %732 = vst.msk [vmem:[%s1101_s8 + $0x1c] sm:$0xf] %vm724_vm2, %v699_v44 }
  0xca   : > { %589 = vst.msk [vmem:[%s1107_s11 + $0x58] sm:$0xf] %vm566_vm3, %v556_v45  ;;  %v541_v47 = vpack.c.bf16 %v509_v46, %v509_v46 }
  0xcb   : > { %v479_v48 = vpop.f32.mrf.mxu2 }
  0xcc   : > { %574 = vst.msk [vmem:[%s1107_s11 + $0x1c] sm:$0xf] %vm566_vm3, %v541_v47  ;;  %v480_v49 = vadd.f32 %v1094_v20, %v479_v48  ;;  %v669_v50 = vpop.f32.mrf.mxu3 }
  0xcd   : > { %v715_v51 = vpack.c.bf16 %v669_v50, %v669_v50  ;;  %v442_v52 = vpop.f32.mrf.mxu0 }
  0xce   : > { %v525_v53 = vmax.f32 %v480_v49, 0.0  ;;  %v443_v54 = vadd.f32 %v1094_v20, %v442_v52  ;;  %v632_v55 = vpop.f32.mrf.mxu1 }
  0xcf   : > { %748 = vst.msk [vmem:[%s1101_s8 + $0x5c] sm:$0xf] %vm724_vm2, %v715_v51  ;;  %v700_v56 = vpack.c.bf16 %v632_v55, %v632_v55 }
  0xd0   : > { %v557_v57 = vpack.c.bf16 %v525_v53, %v525_v53  ;;  %v510_v58 = vmax.f32 %v443_v54, 0.0 }
  0xd1   : > { %733 = vst.msk [vmem:[%s1101_s8 + $0x20] sm:$0xf] %vm724_vm2, %v700_v56 }
  0xd2   : > { %590 = vst.msk [vmem:[%s1107_s11 + $0x5c] sm:$0xf] %vm566_vm3, %v557_v57  ;;  %v542_v59 = vpack.c.bf16 %v510_v58, %v510_v58 }
  0xd3   : > { %v482_v60 = vpop.f32.mrf.mxu2 }
  0xd4   : > { %575 = vst.msk [vmem:[%s1107_s11 + $0x20] sm:$0xf] %vm566_vm3, %v542_v59  ;;  %v483_v61 = vadd.f32 %v1094_v20, %v482_v60  ;;  %v672_v62 = vpop.f32.mrf.mxu3 }
  0xd5   : > { %v716_v63 = vpack.c.bf16 %v672_v62, %v672_v62  ;;  %v444_v0 = vpop.f32.mrf.mxu0 }
  0xd6   : > { %v526_v1 = vmax.f32 %v483_v61, 0.0  ;;  %v445_v2 = vadd.f32 %v1094_v20, %v444_v0  ;;  %v634_v3 = vpop.f32.mrf.mxu1 }
  0xd7   : > { %749 = vst.msk [vmem:[%s1101_s8 + $0x60] sm:$0xf] %vm724_vm2, %v716_v63  ;;  %v701_v4 = vpack.c.bf16 %v634_v3, %v634_v3 }
  0xd8   : > { %v558_v5 = vpack.c.bf16 %v526_v1, %v526_v1  ;;  %v511_v6 = vmax.f32 %v445_v2, 0.0 }
  0xd9   : > { %734 = vst.msk [vmem:[%s1101_s8 + $0x24] sm:$0xf] %vm724_vm2, %v701_v4 }
  0xda   : > { %591 = vst.msk [vmem:[%s1107_s11 + $0x60] sm:$0xf] %vm566_vm3, %v558_v5  ;;  %v543_v7 = vpack.c.bf16 %v511_v6, %v511_v6 }
  0xdb   : > { %v484_v8 = vpop.f32.mrf.mxu2 }
  0xdc   : > { %576 = vst.msk [vmem:[%s1107_s11 + $0x24] sm:$0xf] %vm566_vm3, %v543_v7  ;;  %v485_v9 = vadd.f32 %v1094_v20, %v484_v8  ;;  %v674_v10 = vpop.f32.mrf.mxu3 }
  0xdd   : > { %v717_v11 = vpack.c.bf16 %v674_v10, %v674_v10  ;;  %v447_v12 = vpop.f32.mrf.mxu0 }
  0xde   : > { %v527_v13 = vmax.f32 %v485_v9, 0.0  ;;  %v448_v14 = vadd.f32 %v1094_v20, %v447_v12  ;;  %v637_v15 = vpop.f32.mrf.mxu1 }
  0xdf   : > { %750 = vst.msk [vmem:[%s1101_s8 + $0x64] sm:$0xf] %vm724_vm2, %v717_v11  ;;  %v702_v16 = vpack.c.bf16 %v637_v15, %v637_v15 }
  0xe0   : > { %v559_v17 = vpack.c.bf16 %v527_v13, %v527_v13  ;;  %v512_v18 = vmax.f32 %v448_v14, 0.0 }
  0xe1   : > { %735 = vst.msk [vmem:[%s1101_s8 + $0x28] sm:$0xf] %vm724_vm2, %v702_v16 }
  0xe2   : > { %592 = vst.msk [vmem:[%s1107_s11 + $0x64] sm:$0xf] %vm566_vm3, %v559_v17  ;;  %v544_v19 = vpack.c.bf16 %v512_v18, %v512_v18 }
  0xe3   : > { %v487_v21 = vpop.f32.mrf.mxu2 }
  0xe4   : > { %577 = vst.msk [vmem:[%s1107_s11 + $0x28] sm:$0xf] %vm566_vm3, %v544_v19  ;;  %v488_v22 = vadd.f32 %v1094_v20, %v487_v21  ;;  %v677_v23 = vpop.f32.mrf.mxu3 }
  0xe5   : > { %v718_v24 = vpack.c.bf16 %v677_v23, %v677_v23  ;;  %v449_v25 = vpop.f32.mrf.mxu0 }
  0xe6   : > { %v528_v26 = vmax.f32 %v488_v22, 0.0  ;;  %v450_v27 = vadd.f32 %v1094_v20, %v449_v25  ;;  %v639_v28 = vpop.f32.mrf.mxu1 }
  0xe7   : > { %751 = vst.msk [vmem:[%s1101_s8 + $0x68] sm:$0xf] %vm724_vm2, %v718_v24  ;;  %v703_v29 = vpack.c.bf16 %v639_v28, %v639_v28 }
  0xe8   : > { %v560_v30 = vpack.c.bf16 %v528_v26, %v528_v26  ;;  %v513_v31 = vmax.f32 %v450_v27, 0.0 }
  0xe9   : > { %736 = vst.msk [vmem:[%s1101_s8 + $0x2c] sm:$0xf] %vm724_vm2, %v703_v29 }
  0xea   : > { %593 = vst.msk [vmem:[%s1107_s11 + $0x68] sm:$0xf] %vm566_vm3, %v560_v30  ;;  %v545_v32 = vpack.c.bf16 %v513_v31, %v513_v31 }
  0xeb   : > { %v489_v33 = vpop.f32.mrf.mxu2 }
  0xec   : > { %578 = vst.msk [vmem:[%s1107_s11 + $0x2c] sm:$0xf] %vm566_vm3, %v545_v32  ;;  %v490_v34 = vadd.f32 %v1094_v20, %v489_v33  ;;  %v679_v35 = vpop.f32.mrf.mxu3 }
  0xed   : > { %v719_v36 = vpack.c.bf16 %v679_v35, %v679_v35  ;;  %v452_v37 = vpop.f32.mrf.mxu0 }
  0xee   : > { %v529_v38 = vmax.f32 %v490_v34, 0.0  ;;  %v453_v39 = vadd.f32 %v1094_v20, %v452_v37  ;;  %v642_v40 = vpop.f32.mrf.mxu1 }
  0xef   : > { %752 = vst.msk [vmem:[%s1101_s8 + $0x6c] sm:$0xf] %vm724_vm2, %v719_v36  ;;  %v704_v41 = vpack.c.bf16 %v642_v40, %v642_v40 }
  0xf0   : > { %v561_v42 = vpack.c.bf16 %v529_v38, %v529_v38  ;;  %v514_v43 = vmax.f32 %v453_v39, 0.0 }
  0xf1   : > { %737 = vst.msk [vmem:[%s1101_s8 + $0x30] sm:$0xf] %vm724_vm2, %v704_v41 }
  0xf2   : > { %594 = vst.msk [vmem:[%s1107_s11 + $0x6c] sm:$0xf] %vm566_vm3, %v561_v42  ;;  %v546_v44 = vpack.c.bf16 %v514_v43, %v514_v43 }
  0xf3   : > { %v492_v45 = vpop.f32.mrf.mxu2 }
  0xf4   : > { %579 = vst.msk [vmem:[%s1107_s11 + $0x30] sm:$0xf] %vm566_vm3, %v546_v44  ;;  %v493_v46 = vadd.f32 %v1094_v20, %v492_v45  ;;  %v682_v47 = vpop.f32.mrf.mxu3 }
  0xf5   : > { %v720_v48 = vpack.c.bf16 %v682_v47, %v682_v47  ;;  %v454_v49 = vpop.f32.mrf.mxu0 }
  0xf6   : > { %v530_v50 = vmax.f32 %v493_v46, 0.0  ;;  %v455_v51 = vadd.f32 %v1094_v20, %v454_v49  ;;  %v644_v52 = vpop.f32.mrf.mxu1 }
  0xf7   : > { %753 = vst.msk [vmem:[%s1101_s8 + $0x70] sm:$0xf] %vm724_vm2, %v720_v48  ;;  %v705_v53 = vpack.c.bf16 %v644_v52, %v644_v52 }
  0xf8   : > { %v562_v54 = vpack.c.bf16 %v530_v50, %v530_v50  ;;  %v515_v55 = vmax.f32 %v455_v51, 0.0 }
  0xf9   : > { %738 = vst.msk [vmem:[%s1101_s8 + $0x34] sm:$0xf] %vm724_vm2, %v705_v53 }
  0xfa   : > { %595 = vst.msk [vmem:[%s1107_s11 + $0x70] sm:$0xf] %vm566_vm3, %v562_v54  ;;  %v547_v56 = vpack.c.bf16 %v515_v55, %v515_v55 }
  0xfb   : > { %v494_v57 = vpop.f32.mrf.mxu2 }
  0xfc   : > { %580 = vst.msk [vmem:[%s1107_s11 + $0x34] sm:$0xf] %vm566_vm3, %v547_v56  ;;  %v495_v58 = vadd.f32 %v1094_v20, %v494_v57  ;;  %v684_v59 = vpop.f32.mrf.mxu3 }
  0xfd   : > { %v721_v60 = vpack.c.bf16 %v684_v59, %v684_v59  ;;  %v457_v61 = vpop.f32.mrf.mxu0 }
  0xfe   : > { %v531_v62 = vmax.f32 %v495_v58, 0.0  ;;  %v458_v63 = vadd.f32 %v1094_v20, %v457_v61  ;;  %v647_v0 = vpop.f32.mrf.mxu1 }
  0xff   : > { %754 = vst.msk [vmem:[%s1101_s8 + $0x74] sm:$0xf] %vm724_vm2, %v721_v60  ;;  %v706_v1 = vpack.c.bf16 %v647_v0, %v647_v0 }
 0x100   : > { %v563_v2 = vpack.c.bf16 %v531_v62, %v531_v62  ;;  %v516_v3 = vmax.f32 %v458_v63, 0.0 }
 0x101   : > { %739 = vst.msk [vmem:[%s1101_s8 + $0x38] sm:$0xf] %vm724_vm2, %v706_v1 }
 0x102   : > { %596 = vst.msk [vmem:[%s1107_s11 + $0x74] sm:$0xf] %vm566_vm3, %v563_v2  ;;  %v548_v4 = vpack.c.bf16 %v516_v3, %v516_v3 }
 0x103   : > { %v497_v5 = vpop.f32.mrf.mxu2 }
 0x104   : > { %581 = vst.msk [vmem:[%s1107_s11 + $0x38] sm:$0xf] %vm566_vm3, %v548_v4  ;;  %v498_v6 = vadd.f32 %v1094_v20, %v497_v5  ;;  %v687_v7 = vpop.f32.mrf.mxu3 }
 0x105   : > { %v722_v8 = vpack.c.bf16 %v687_v7, %v687_v7  ;;  %v459_v9 = vpop.f32.mrf.mxu0 }
 0x106   : > { %v532_v10 = vmax.f32 %v498_v6, 0.0  ;;  %v460_v11 = vadd.f32 %v1094_v20, %v459_v9  ;;  %v649_v12 = vpop.f32.mrf.mxu1 }
 0x107   : > { %755 = vst.msk [vmem:[%s1101_s8 + $0x78] sm:$0xf] %vm724_vm2, %v722_v8  ;;  %v707_v13 = vpack.c.bf16 %v649_v12, %v649_v12 }
 0x108   : > { %v564_v14 = vpack.c.bf16 %v532_v10, %v532_v10  ;;  %v517_v15 = vmax.f32 %v460_v11, 0.0 }
 0x109   : > { %740 = vst.msk [vmem:[%s1101_s8 + $0x3c] sm:$0xf] %vm724_vm2, %v707_v13 }
 0x10a   : > { %597 = vst.msk [vmem:[%s1107_s11 + $0x78] sm:$0xf] %vm566_vm3, %v564_v14  ;;  %v549_v16 = vpack.c.bf16 %v517_v15, %v517_v15 }
 0x10b   : > { %v499_v17 = vpop.f32.mrf.mxu2 }
 0x10c   : > { %582 = vst.msk [vmem:[%s1107_s11 + $0x3c] sm:$0xf] %vm566_vm3, %v549_v16  ;;  %v500_v18 = vadd.f32 %v1094_v20, %v499_v17  ;;  %v689_v19 = vpop.f32.mrf.mxu3 }
 0x10d   : > { %v723_v21 = vpack.c.bf16 %v689_v19, %v689_v19 }
 0x10e   : > { %v533_v22 = vmax.f32 %v500_v18, 0.0 }
 0x10f   : > { %756 = vst.msk [vmem:[%s1101_s8 + $0x7c] sm:$0xf] %vm724_vm2, %v723_v21 }
 0x110   : > { %v565_v23 = vpack.c.bf16 %v533_v22, %v533_v22 }
 0x112   : > { %598 = vst.msk [vmem:[%s1107_s11 + $0x7c] sm:$0xf] %vm566_vm3, %v565_v23 }
 0x113 PF: > { %s16_s18 = sadd.s32 1, %s989_s18  }
 0x114   : > { %p13_p4 = scmp.ge.s32.totalorder %s16_s18, 4  }
 0x116   :  { %15 = sbr.rel (!%p13_p4) target bundleno = 1 (0x1), region = 78 }

</bundles_post_ra>
